<compile_context>
chip_gen: v7x
topology: tpu7x:2x2x1
jax: 0.10.0
libtpu: 0.0.40
codegen_flags: <defaults>
</compile_context>

<pallas_src>
import jax
import jax.numpy as jnp
from jax.experimental import pallas as pl
from jax.experimental.pallas import tpu as pltpu


_NEG_LARGE = -1e30  # fill for padded vocab columns (never wins max, exp -> 0)


def _round_up(a: int, b: int) -> int:
    return (a + b - 1) // b * b


def _vmem_capacity_bytes() -> int:
    """Physical VMEM per core, with a conservative fallback (v7x size)."""
    try:
        info = pltpu.get_tpu_info()
        cap = getattr(info, "vmem_capacity_bytes", None)
        if cap:
            return int(cap)
    except Exception:
        pass
    return 64 * 1024 * 1024


def _pick_tk(d_model: int, max_tk: int = 512) -> int:
    """Lane-aligned contraction tile that divides d_model."""
    if d_model % 128 != 0:
        # Small / irregular d_model: use the full dim (full-dim BlockSpec rule).
        return d_model
    tk = min(max_tk, d_model)
    tk = (tk // 128) * 128
    while d_model % tk != 0:
        tk -= 128
    return max(tk, 128)


# ---------------------------------------------------------------------------
# Pass 1: logits tiles + per-row streaming logsumexp.
# ---------------------------------------------------------------------------
def _logits_lse_kernel(x_ref, w_ref, b_ref, logits_ref, lse_ref,
                       acc_ref, m_ref, s_ref):
    # x_ref: (TM, TK)   w_ref: (TK, TN)   b_ref: (1, TN)
    # logits_ref: (TM, TN) f32   lse_ref: (TM, 1) f32
    # acc_ref: (TM, TN) f32      m_ref/s_ref: (TM, 1) f32 running max / sum-exp
    j = pl.program_id(1)
    k = pl.program_id(2)
    nj = pl.num_programs(1)
    nk = pl.num_programs(2)

    @pl.when(jnp.logical_and(j == 0, k == 0))
    def _():
        # New row tile: reset the streaming-LSE state.
        m_ref[...] = jnp.full_like(m_ref, -jnp.inf)
        s_ref[...] = jnp.zeros_like(s_ref)

    @pl.when(k == 0)
    def _():
        # Fold the bias add into the accumulator init (saves a (TM, TN) VPU
        # add + broadcast per vocab tile).
        acc_ref[...] = jnp.broadcast_to(
            b_ref[...].astype(jnp.float32), acc_ref.shape
        )

    # Native-dtype operands into the MXU, f32 accumulation.
    acc_ref[...] += jnp.dot(
        x_ref[...], w_ref[...], preferred_element_type=jnp.float32
    )

    @pl.when(k == nk - 1)
    def _():
        logits = acc_ref[...]
        logits_ref[...] = logits.astype(logits_ref.dtype)
        # Online LSE update (per vocab tile, f32 math).
        m_prev = m_ref[...]
        m_new = jnp.maximum(m_prev, jnp.max(logits, axis=-1, keepdims=True))
        s_ref[...] = s_ref[...] * jnp.exp(m_prev - m_new) + jnp.sum(
            jnp.exp(logits - m_new), axis=-1, keepdims=True
        )
        m_ref[...] = m_new

    @pl.when(jnp.logical_and(j == nj - 1, k == nk - 1))
    def _():
        lse_ref[...] = m_ref[...] + jnp.log(s_ref[...])


# ---------------------------------------------------------------------------
# Pass 2: normalize logits with the per-row logsumexp.
# ---------------------------------------------------------------------------
def _normalize_kernel(logits_ref, lse_ref, o_ref):
    o_ref[...] = (logits_ref[...] - lse_ref[...]).astype(o_ref.dtype)


def generator_forward(x, w_t, bias2d, *, tile_m_target=512, tile_n_target=2048,
                      max_tk=512):
    """Generator forward: log_softmax(x @ W^T + b, axis=-1).

    x:      (batch, seq, d_model)  activations (f32 or bf16)
    w_t:    (d_model, vocab)       pre-transposed Linear weight (f32 or bf16)
    bias2d: (1, vocab)             Linear bias
    """
    batch, seq, d_model = x.shape
    d_model_w, vocab = w_t.shape
    assert d_model_w == d_model

    n = batch * seq
    out_dtype = x.dtype
    x_bytes = jnp.dtype(x.dtype).itemsize
    w_bytes = jnp.dtype(w_t.dtype).itemsize
    b_bytes = jnp.dtype(bias2d.dtype).itemsize
    out_bytes = jnp.dtype(out_dtype).itemsize

    # ---- tile selection ---------------------------------------------------
    tk = _pick_tk(d_model, max_tk)

    # Row tile: multiple of 16 (bf16 sublane packing); prefer >= 2 row tiles
    # so v7x megacore ("parallel" axis) has work on both TensorCores.
    tile_m = min(tile_m_target, _round_up(n, 16))
    while tile_m > 16 and _round_up(n, tile_m) // tile_m < 2:
        tile_m = max(16, (tile_m // 2) // 16 * 16)

    # Vocab tile: lane-dense multiple of 128 (256 preferred for the 256x256
    # MXU on v6e/v7x; 2048 is a good default at large vocab).
    tile_n = min(tile_n_target, _round_up(vocab, 128))

    # ---- fit tiles into a per-chip VMEM budget -----------------------------
    cap = _vmem_capacity_bytes()
    budget = max(cap - 16 * 1024 * 1024, cap // 2)  # leave headroom for Mosaic

    def _pass1_usage(tm, tn, tkk):
        return (2 * tm * tkk * x_bytes          # x block (double buffered)
                + 2 * tkk * tn * w_bytes        # weight block
                + 2 * tn * b_bytes              # bias block
                + 2 * tm * tn * 4               # f32 logits output block
                + 2 * tm * 4                    # lse output block
                + tm * tn * 4                   # acc scratch
                + 2 * tm * 4)                   # m / s scratch

    while _pass1_usage(tile_m, tile_n, tk) > budget and tile_n > 128:
        tile_n = max(128, (tile_n // 2) // 128 * 128)
    while _pass1_usage(tile_m, tile_n, tk) > budget and tile_m > 16:
        tile_m = max(16, (tile_m // 2) // 16 * 16)

    n_pad = _round_up(n, tile_m)
    vocab_pad = _round_up(vocab, tile_n)

    # ---- padding (one-time-per-call; no pad at all when shapes divide) -----
    # TODO(synk): handle a ragged last row tile with a masked store instead of
    # jnp.pad to avoid the extra activation copy for large training batches.
    x2 = x.reshape(n, d_model)
    if n_pad != n:
        x2 = jnp.pad(x2, ((0, n_pad - n), (0, 0)))
    if vocab_pad != vocab:
        w_t2 = jnp.pad(w_t, ((0, 0), (0, vocab_pad - vocab)))
        b2 = jnp.pad(bias2d, ((0, 0), (0, vocab_pad - vocab)),
                     constant_values=_NEG_LARGE)
    else:
        w_t2, b2 = w_t, bias2d

    usage1 = _pass1_usage(tile_m, tile_n, tk)
    vmem_limit1 = int(min(cap - 4 * 1024 * 1024,
                          max(usage1 + 16 * 1024 * 1024, 32 * 1024 * 1024)))

    # ---- pass 1: logits + per-row logsumexp --------------------------------
    logits, lse = pl.pallas_call(
        _logits_lse_kernel,
        out_shape=(
            jax.ShapeDtypeStruct((n_pad, vocab_pad), jnp.float32),
            jax.ShapeDtypeStruct((n_pad, 1), jnp.float32),
        ),
        grid_spec=pltpu.PrefetchScalarGridSpec(
            num_scalar_prefetch=0,
            grid=(n_pad // tile_m, vocab_pad // tile_n, d_model // tk),
            in_specs=[
                pl.BlockSpec((tile_m, tk), lambda i, j, k: (i, k)),
                pl.BlockSpec((tk, tile_n), lambda i, j, k: (k, j)),
                pl.BlockSpec((1, tile_n), lambda i, j, k: (0, j)),
            ],
            out_specs=[
                pl.BlockSpec((tile_m, tile_n), lambda i, j, k: (i, j)),
                pl.BlockSpec((tile_m, 1), lambda i, j, k: (i, 0)),
            ],
            scratch_shapes=[
                pltpu.VMEM((tile_m, tile_n), jnp.float32),
                pltpu.VMEM((tile_m, 1), jnp.float32),
                pltpu.VMEM((tile_m, 1), jnp.float32),
            ],
        ),
        compiler_params=pltpu.CompilerParams(
            dimension_semantics=("parallel", "arbitrary", "arbitrary"),
            vmem_limit_bytes=vmem_limit1,
        ),
    )(x2, w_t2, b2)

    # ---- pass 2: out = logits - lse ----------------------------------------
    usage2 = (2 * tile_m * tile_n * 4 + 2 * tile_m * 4
              + 2 * tile_m * tile_n * out_bytes)
    vmem_limit2 = int(min(cap - 4 * 1024 * 1024,
                          max(usage2 + 16 * 1024 * 1024, 32 * 1024 * 1024)))

    out = pl.pallas_call(
        _normalize_kernel,
        out_shape=jax.ShapeDtypeStruct((n_pad, vocab_pad), out_dtype),
        grid_spec=pltpu.PrefetchScalarGridSpec(
            num_scalar_prefetch=0,
            grid=(n_pad // tile_m, vocab_pad // tile_n),
            in_specs=[
                pl.BlockSpec((tile_m, tile_n), lambda i, j: (i, j)),
                pl.BlockSpec((tile_m, 1), lambda i, j: (i, 0)),
            ],
            out_specs=pl.BlockSpec((tile_m, tile_n), lambda i, j: (i, j)),
        ),
        compiler_params=pltpu.CompilerParams(
            dimension_semantics=("parallel", "parallel"),
            vmem_limit_bytes=vmem_limit2,
        ),
    )(logits, lse)

    if n_pad != n or vocab_pad != vocab:
        out = out[:n, :vocab]
    return out.reshape(batch, seq, vocab)


if __name__ == "__main__":
    batch, seq, d_model, vocab = 2, 8, 32, 128

    key = jax.random.PRNGKey(0)
    kx, kw, kb = jax.random.split(key, 3)

    # Deterministic parameter init (mimics nn.Linear uniform(-1/sqrt(d), 1/sqrt(d))).
    bound = 1.0 / (d_model ** 0.5)
    weight = jax.random.uniform(kw, (vocab, d_model), jnp.float32, -bound, bound)
    bias = jax.random.uniform(kb, (vocab,), jnp.float32, -bound, bound)
    x = jax.random.normal(kx, (batch, seq, d_model), jnp.float32)

    # One-time parameter prep (hoisted out of the per-call path):
    w_t = jnp.asarray(weight.T)        # (d_model, vocab)
    bias2d = bias.reshape(1, vocab)    # (1, vocab)

    # --- f32 path: tight correctness check vs plain-JAX reference -----------
    out = generator_forward(x, w_t, bias2d)
    out = jax.block_until_ready(out)
    ref = jax.nn.log_softmax(x @ weight.T + bias, axis=-1)
    assert out.shape == (batch, seq, vocab)
    assert jnp.allclose(out, ref, atol=1e-5, rtol=1e-5), "f32 mismatch vs reference"

    # --- bf16 production config: bf16 weights + activations (halves the
    # weight HBM/VMEM stream; MXU is bf16-native on v5e/v6e/v7x) -------------
    x_bf = x.astype(jnp.bfloat16)
    w_t_bf = w_t.astype(jnp.bfloat16)
    out_bf = generator_forward(x_bf, w_t_bf, bias2d)
    out_bf = jax.block_until_ready(out_bf)
    ref_bf = jax.nn.log_softmax(
        x_bf.astype(jnp.float32) @ w_t_bf.astype(jnp.float32) + bias, axis=-1
    )
    assert jnp.allclose(out_bf.astype(jnp.float32), ref_bf, atol=5e-2, rtol=2e-2), \
        "bf16 mismatch vs reference"

    print("KERNEL_OK")
</pallas_src>

<mosaic_0001>
module attributes {stable_mosaic.version = 11 : i64} {
  func.func @_logits_lse_kernel(%arg0: i32, %arg1: i32, %arg2: i32, %arg3: memref<16x32xf32, #tpu.memory_space<vmem>>, %arg4: memref<32x128xf32, #tpu.memory_space<vmem>>, %arg5: memref<1x128xf32, #tpu.memory_space<vmem>>, %arg6: memref<16x128xf32, #tpu.memory_space<vmem>>, %arg7: memref<16x1xf32, #tpu.memory_space<vmem>>, %arg8: memref<16x128xf32, #tpu.memory_space<vmem>>, %arg9: memref<16x1xf32, #tpu.memory_space<vmem>>, %arg10: memref<16x1xf32, #tpu.memory_space<vmem>>) attributes {dimension_semantics = [#tpu.dimension_semantics<parallel>, #tpu.dimension_semantics<arbitrary>, #tpu.dimension_semantics<arbitrary>], iteration_bounds = array<i64: 1, 1, 1>, scalar_prefetch = 0 : i64, scratch_operands = 3 : i64, tpu.core_type = #tpu.core_type<tc>, window_params = [{transform_indices = @transform_0, window_bounds = array<i64: 16, 32>}, {transform_indices = @transform_1, window_bounds = array<i64: 32, 128>}, {transform_indices = @transform_2, window_bounds = array<i64: 1, 128>}, {transform_indices = @transform_3, window_bounds = array<i64: 16, 128>}, {transform_indices = @transform_4, window_bounds = array<i64: 16, 1>}]} {
    %c0_i32 = arith.constant 0 : i32
    %0 = arith.cmpi eq, %arg1, %c0_i32 : i32
    %c0_i32_0 = arith.constant 0 : i32
    %1 = arith.cmpi eq, %arg2, %c0_i32_0 : i32
    %2 = arith.andi %0, %1 : i1
    %3 = arith.extui %2 : i1 to i32
    %c0_i32_1 = arith.constant 0 : i32
    %4 = arith.cmpi ne, %3, %c0_i32_1 : i32
    scf.if %4 {
      %cst_16 = arith.constant 0xFF800000 : f32
      %22 = vector.broadcast %cst_16 : f32 to vector<16x1xf32>
      %c0_17 = arith.constant 0 : index
      %c0_18 = arith.constant 0 : index
      %23 = vector.load %arg9[%c0_17, %c0_18] : memref<16x1xf32, #tpu.memory_space<vmem>>, vector<16x1xf32>
      tpu.vector_store %arg9[%c0_17, %c0_18], %22 {strides = array<i32>} : memref<16x1xf32, #tpu.memory_space<vmem>>, vector<16x1xf32>,
      %cst_19 = arith.constant 0.000000e+00 : f32
      %24 = vector.broadcast %cst_19 : f32 to vector<16x1xf32>
      %c0_20 = arith.constant 0 : index
      %c0_21 = arith.constant 0 : index
      %25 = vector.load %arg10[%c0_20, %c0_21] : memref<16x1xf32, #tpu.memory_space<vmem>>, vector<16x1xf32>
      tpu.vector_store %arg10[%c0_20, %c0_21], %24 {strides = array<i32>} : memref<16x1xf32, #tpu.memory_space<vmem>>, vector<16x1xf32>,
    } else {
    }
    %c0_i32_2 = arith.constant 0 : i32
    %5 = arith.cmpi eq, %arg2, %c0_i32_2 : i32
    %6 = arith.extui %5 : i1 to i32
    %c0_i32_3 = arith.constant 0 : i32
    %7 = arith.cmpi ne, %6, %c0_i32_3 : i32
    scf.if %7 {
      %c0_16 = arith.constant 0 : index
      %c0_17 = arith.constant 0 : index
      %22 = vector.load %arg5[%c0_16, %c0_17] : memref<1x128xf32, #tpu.memory_space<vmem>>, vector<1x128xf32>
      %23 = vector.shape_cast %22 : vector<1x128xf32> to vector<1x128xf32>
      %24 = vector.broadcast %23 : vector<1x128xf32> to vector<16x128xf32>
      %c0_18 = arith.constant 0 : index
      %c0_19 = arith.constant 0 : index
      %25 = vector.load %arg8[%c0_18, %c0_19] : memref<16x128xf32, #tpu.memory_space<vmem>>, vector<16x128xf32>
      tpu.vector_store %arg8[%c0_18, %c0_19], %24 {strides = array<i32>} : memref<16x128xf32, #tpu.memory_space<vmem>>, vector<16x128xf32>,
    } else {
    }
    %c0 = arith.constant 0 : index
    %c0_4 = arith.constant 0 : index
    %8 = vector.load %arg8[%c0, %c0_4] : memref<16x128xf32, #tpu.memory_space<vmem>>, vector<16x128xf32>
    %c0_5 = arith.constant 0 : index
    %c0_6 = arith.constant 0 : index
    %9 = vector.load %arg3[%c0_5, %c0_6] : memref<16x32xf32, #tpu.memory_space<vmem>>, vector<16x32xf32>
    %c0_7 = arith.constant 0 : index
    %c0_8 = arith.constant 0 : index
    %10 = vector.load %arg4[%c0_7, %c0_8] : memref<32x128xf32, #tpu.memory_space<vmem>>, vector<32x128xf32>
    %cst = arith.constant dense<0.000000e+00> : vector<16x128xf32>
    %11 = tpu.matmul %9, %10, %cst {dimension_numbers = #tpu.dot_dimension_numbers<[1], [0], [0], [1], [0, 0, 1, 1], [], []>} : vector<16x32xf32>, vector<32x128xf32>, vector<16x128xf32> -> vector<16x128xf32>
    %12 = arith.addf %8, %11 : vector<16x128xf32>
    %c0_9 = arith.constant 0 : index
    %c0_10 = arith.constant 0 : index
    %13 = vector.load %arg8[%c0_9, %c0_10] : memref<16x128xf32, #tpu.memory_space<vmem>>, vector<16x128xf32>
    tpu.vector_store %arg8[%c0_9, %c0_10], %12 {strides = array<i32>} : memref<16x128xf32, #tpu.memory_space<vmem>>, vector<16x128xf32>,
    %c0_i32_11 = arith.constant 0 : i32
    %14 = arith.cmpi eq, %arg2, %c0_i32_11 : i32
    %15 = arith.extui %14 : i1 to i32
    %c0_i32_12 = arith.constant 0 : i32
    %16 = arith.cmpi ne, %15, %c0_i32_12 : i32
    scf.if %16 {
      %c0_16 = arith.constant 0 : index
      %c0_17 = arith.constant 0 : index
      %22 = vector.load %arg8[%c0_16, %c0_17] : memref<16x128xf32, #tpu.memory_space<vmem>>, vector<16x128xf32>
      %c0_18 = arith.constant 0 : index
      %c0_19 = arith.constant 0 : index
      %23 = vector.load %arg6[%c0_18, %c0_19] : memref<16x128xf32, #tpu.memory_space<vmem>>, vector<16x128xf32>
      tpu.vector_store %arg6[%c0_18, %c0_19], %22 {strides = array<i32>} : memref<16x128xf32, #tpu.memory_space<vmem>>, vector<16x128xf32>,
      %c0_20 = arith.constant 0 : index
      %c0_21 = arith.constant 0 : index
      %24 = vector.load %arg9[%c0_20, %c0_21] : memref<16x1xf32, #tpu.memory_space<vmem>>, vector<16x1xf32>
      %cst_22 = arith.constant dense<0xFF800000> : vector<16xf32>
      %25 = vector.multi_reduction <maximumf>, %22, %cst_22 [1] : vector<16x128xf32> to vector<16xf32>
      %26 = vector.shape_cast %25 : vector<16xf32> to vector<16x1xf32>
      %27 = arith.maximumf %24, %26 : vector<16x1xf32>
      %c0_23 = arith.constant 0 : index
      %c0_24 = arith.constant 0 : index
      %28 = vector.load %arg10[%c0_23, %c0_24] : memref<16x1xf32, #tpu.memory_space<vmem>>, vector<16x1xf32>
      %29 = arith.subf %24, %27 : vector<16x1xf32>
      %30 = math.exp %29 : vector<16x1xf32>
      %31 = arith.mulf %28, %30 : vector<16x1xf32>
      %32 = vector.broadcast %27 : vector<16x1xf32> to vector<16x128xf32>
      %33 = arith.subf %22, %32 : vector<16x128xf32>
      %34 = math.exp %33 : vector<16x128xf32>
      %cst_25 = arith.constant dense<0.000000e+00> : vector<16xf32>
      %35 = vector.multi_reduction <add>, %34, %cst_25 [1] : vector<16x128xf32> to vector<16xf32>
      %36 = vector.shape_cast %35 : vector<16xf32> to vector<16x1xf32>
      %37 = arith.addf %31, %36 : vector<16x1xf32>
      %c0_26 = arith.constant 0 : index
      %c0_27 = arith.constant 0 : index
      %38 = vector.load %arg10[%c0_26, %c0_27] : memref<16x1xf32, #tpu.memory_space<vmem>>, vector<16x1xf32>
      tpu.vector_store %arg10[%c0_26, %c0_27], %37 {strides = array<i32>} : memref<16x1xf32, #tpu.memory_space<vmem>>, vector<16x1xf32>,
      %c0_28 = arith.constant 0 : index
      %c0_29 = arith.constant 0 : index
      %39 = vector.load %arg9[%c0_28, %c0_29] : memref<16x1xf32, #tpu.memory_space<vmem>>, vector<16x1xf32>
      tpu.vector_store %arg9[%c0_28, %c0_29], %27 {strides = array<i32>} : memref<16x1xf32, #tpu.memory_space<vmem>>, vector<16x1xf32>,
    } else {
    }
    %c0_i32_13 = arith.constant 0 : i32
    %17 = arith.cmpi eq, %arg1, %c0_i32_13 : i32
    %c0_i32_14 = arith.constant 0 : i32
    %18 = arith.cmpi eq, %arg2, %c0_i32_14 : i32
    %19 = arith.andi %17, %18 : i1
    %20 = arith.extui %19 : i1 to i32
    %c0_i32_15 = arith.constant 0 : i32
    %21 = arith.cmpi ne, %20, %c0_i32_15 : i32
    scf.if %21 {
      %c0_16 = arith.constant 0 : index
      %c0_17 = arith.constant 0 : index
      %22 = vector.load %arg9[%c0_16, %c0_17] : memref<16x1xf32, #tpu.memory_space<vmem>>, vector<16x1xf32>
      %c0_18 = arith.constant 0 : index
      %c0_19 = arith.constant 0 : index
      %23 = vector.load %arg10[%c0_18, %c0_19] : memref<16x1xf32, #tpu.memory_space<vmem>>, vector<16x1xf32>
      %24 = math.log %23 : vector<16x1xf32>
      %25 = arith.addf %22, %24 : vector<16x1xf32>
      %c0_20 = arith.constant 0 : index
      %c0_21 = arith.constant 0 : index
      %26 = vector.load %arg7[%c0_20, %c0_21] : memref<16x1xf32, #tpu.memory_space<vmem>>, vector<16x1xf32>
      tpu.vector_store %arg7[%c0_20, %c0_21], %25 {strides = array<i32>} : memref<16x1xf32, #tpu.memory_space<vmem>>, vector<16x1xf32>,
    } else {
    }
    return
  }
  func.func @transform_0(%arg0: i32, %arg1: i32, %arg2: i32) -> (i32, i32) {
    %c0_i32 = arith.constant 0 : i32
    return %arg0, %arg2 : i32, i32
  }
  func.func @transform_1(%arg0: i32, %arg1: i32, %arg2: i32) -> (i32, i32) {
    %c0_i32 = arith.constant 0 : i32
    return %arg2, %arg1 : i32, i32
  }
  func.func @transform_2(%arg0: i32, %arg1: i32, %arg2: i32) -> (i32, i32) {
    %c0_i32 = arith.constant 0 : i32
    %c0_i32_0 = arith.constant 0 : i32
    return %c0_i32, %arg1 : i32, i32
  }
  func.func @transform_3(%arg0: i32, %arg1: i32, %arg2: i32) -> (i32, i32) {
    %c0_i32 = arith.constant 0 : i32
    return %arg0, %arg1 : i32, i32
  }
  func.func @transform_4(%arg0: i32, %arg1: i32, %arg2: i32) -> (i32, i32) {
    %c0_i32 = arith.constant 0 : i32
    %c0_i32_0 = arith.constant 0 : i32
    return %arg0, %c0_i32 : i32, i32
  }
}

</mosaic_0001>

<bundles_post_ra>
// kernel: tpu_custom_call.1
= control target key start
LH: loop header
LB: loop body
LE: loop exit
PB: predicated region body
PF: predicated region fallthrough
CT: control target
= control target key end

     0   :  { %10 = vsyncpa [#allocation6], 0  ;;  %s470_s0 = inlined_call_operand.hbm [shape: f32[16,32], index: 0, kind: input, shape index: {}]   ;;  %s471_s1 = inlined_call_operand.hbm [shape: f32[32,128], index: 1, kind: input, shape index: {}]   ;;  %s472_s2 = inlined_call_operand.vmem [shape: f32[1,128], index: 2, kind: input, shape index: {}]   ;;  %s473_s3 = inlined_call_operand.hbm [shape: f32[16,128], index: 3, kind: output, shape index: {0}]   ;;  %s474_s4 = inlined_call_operand.vmem [shape: f32[16,1], index: 4, kind: output, shape index: {1}]  }
   0x1   :  { %11 = vsyncpa [#allocation9], 0 }
   0x2   :  { %12 = vsyncpa [#allocation7], 0  ;;  %s373_s15 = smov [#allocation5]   ;;  %s301_s19 = scalar_lea.hbm %s470_s0, 256 }
   0x3   :  { %s18_s16 = sshll.u32 %s373_s15, 4  ;;  %p302_p0 = scmp.ne.s32.totalorder %s470_s0, %s301_s19  ;;  %s19_s16 = int_to_ptr.vmem [resolvable:$true] %s18_s16 }
   0x4   :  { %p305_p1 = scmp.lt.u32.totalorder %s301_s19, %s470_s0 }
   0x6   :  { %p307_p2 = pnand %p305_p1, %p302_p0 }
   0x8   :  { %310 = shalt.err (!%p307_p2)
}
   0x9   :  { %s311_s24 = scalar_lea.vmem %s19_s16, 256  ;;  %p316_p4 = scmp.lt.s32.totalorder %s19_s16, %s19_s16 }
   0xa   :  { %p312_p3 = scmp.ne.s32.totalorder %s19_s16, %s311_s24  ;;  %p317_p5 = scmp.lt.s32.totalorder %s311_s24, %s311_s24 }
   0xc   :  { %p318_p6 = por %p317_p5, %p316_p4 }
   0xe   :  { %p319_p7 = pnand %p318_p6, %p312_p3 }
  0x10   :  { %322 = shalt.err (!%p319_p7)
}
  0x11   :  { %s374_s25 = smov 128   ;;  %s375_s26 = smov 8  }
  0x12   :  { %24 = dma.hbm_to_vmem [thread:$0]  %s470_s0, 256, %s19_s16, [#allocation6], %s374_s25, %s374_s25, %s375_s26  }
  0x13   :  { %s376_s29 = smov [#allocation8]   ;;  %s323_s7 = scalar_lea.hbm %s471_s1, 512 }
  0x14   :  { %s30_s30 = sshll.u32 %s376_s29, 4  ;;  %p324_p8 = scmp.ne.s32.totalorder %s471_s1, %s323_s7  ;;  %s31_s30 = int_to_ptr.vmem [resolvable:$true] %s30_s30 }
  0x15   :  { %p327_p9 = scmp.lt.u32.totalorder %s323_s7, %s471_s1 }
  0x17   :  { %p329_p10 = pnand %p327_p9, %p324_p8 }
  0x19   :  { %332 = shalt.err (!%p329_p10)
}
  0x1a   :  { %s333_s12 = scalar_lea.vmem %s31_s30, 512  ;;  %p338_p12 = scmp.lt.s32.totalorder %s31_s30, %s31_s30 }
  0x1b   :  { %p334_p11 = scmp.ne.s32.totalorder %s31_s30, %s333_s12  ;;  %p339_p13 = scmp.lt.s32.totalorder %s333_s12, %s333_s12 }
  0x1d   :  { %p340_p0 = por %p339_p13, %p338_p12 }
  0x1f   :  { %p341_p1 = pnand %p340_p0, %p334_p11 }
  0x21   :  { %344 = shalt.err (!%p341_p1)
}
  0x22   :  { %36 = dma.hbm_to_vmem [thread:$0]  %s471_s1, 512, %s31_s30, [#allocation9], %s374_s25, %s374_s25, %s375_s26  }
  0x23   :  { %367 = dma.done.wait [#allocation6], 256  }
  0x24   :  { %368 = vsyncadd [#allocation6], 4294967040 }
  0x25   :  { %369 = dma.done.wait [#allocation9], 512  }
  0x26   :  { %370 = vsyncadd [#allocation9], 4294966784  ;;  %vm76_vm0 = vcmask 261120   ;;  %v72_v0 = vld [vmem:[#allocation8] sm:$0xff]  ;;  %v73_v1 = vld [vmem:[#allocation8 + $0x8] sm:$0xff]  ;;  %vm51_vm1 = vcmask 7168  }
  0x27   :  { %v74_v2 = vld [vmem:[#allocation8 + $0x10] sm:$0xff]  ;;  %v271_v3 = vpack.c.bf16 %v73_v1, %v72_v0  ;;  %v75_v4 = vld [vmem:[#allocation8 + $0x18] sm:$0xff]  ;;  %v377_v8 = vmov -inf   ;;  %v378_v14 = vmov 0   ;;  %v379_v15 = vmov 0.0  }
  0x28   :  { %v70_v5 = vld [vmem:[#allocation5] sm:$0xff]  ;;  %v275_v6 = vpack.c.bf16 %v75_v4, %v74_v2  ;;  %v71_v7 = vld [vmem:[#allocation5 + $0x8] sm:$0xff]  ;;  %52 = vst.msk [vmem:[#allocation3] sm:$0xff] %vm51_vm1, %v377_v8  ;;  %53 = vst.msk [vmem:[#allocation3 + $0x8] sm:$0xff] %vm51_vm1, %v377_v8  ;;  %287 = vset.pattern.permute.xlu1 %v378_v14  ;;  %288 = vset.pattern.permute.xlu0 %v378_v14 }
  0x29   :  { %268 = vmatprep.mubr.msk.f32.mxu0 %vm76_vm0, %v70_v5  ;;  %272 = vmatprep.subr.bf16.mxu0 %v271_v3  ;;  %v251_v9 = vld [vmem:[%s472_s2] ss:$0 sm:$0xff]  ;;  %54 = vst.msk [vmem:[#allocation4] sm:$0xff] %vm51_vm1, %v379_v15  ;;  %55 = vst.msk [vmem:[#allocation4 + $0x8] sm:$0xff] %vm51_vm1, %v379_v15  ;;  %s380_s2 = smov [#allocation10]  }
  0x2a   :  { %274 = vmatpush3.bf16.msra.mxu0 %v271_v3  ;;  %s234_s15 = sshll.u32 %s380_s2, 4  ;;  %s235_s15 = int_to_ptr.vmem [resolvable:$true] %s234_s15 }
  0x2b   :  { %276 = vmatprep.subr.bf16.mxu0 %v275_v6  ;;  %s345_s16 = scalar_lea.vmem %s235_s15, 256  ;;  %p350_p3 = scmp.lt.s32.totalorder %s235_s15, %s235_s15 }
  0x2c   :  { %p346_p2 = scmp.ne.s32.totalorder %s235_s15, %s345_s16  ;;  %p351_p4 = scmp.lt.s32.totalorder %s345_s16, %s345_s16 }
  0x2e   :  { %278 = vmatpush3.bf16.msra.mxu0 %v275_v6  ;;  %p352_p5 = por %p351_p4, %p350_p3 }
  0x2f   :  { %v169_v16 = vld [vmem:[#allocation3] sm:$0xff]  ;;  %v170_v19 = vld [vmem:[#allocation3 + $0x8] sm:$0xff] }
  0x30   :  { %p353_p6 = pnand %p352_p5, %p346_p2 }
  0x31   :  { %269 = vmatmul.mubr.msk.f32.vlgmr.msra.gmra.mrb[0].mxu0 %vm76_vm0, %v71_v7 }
 0x104   :  { %v270_v10 = vpop.f32.mrb[0].mxu0 }
 0x105   :  { %v159_v11 = vadd.f32 %v270_v10, %v251_v9  ;;  %v149_v12 = vpop.f32.mrb[1].mxu0 }
 0x106   :  { %v158_v13 = vadd.f32 %v251_v9, %v149_v12 }
 0x107   :  { %168 = vst [vmem:[#allocation10 + $0x8] sm:$0xff] %v159_v11 }
 0x108   :  { %167 = vst [vmem:[#allocation10] sm:$0xff] %v158_v13  ;;  %171 = vmax.xlane.f32.xlu0 %v158_v13 }
 0x10c   :  { %173 = vmax.xlane.f32.xlu0 %v159_v11 }
 0x195   :  { %v172_v17 = vpop.xlane.xlu0 %171 }
 0x196   :  { %v175_v18 = vmax.f32 %v169_v16, %v172_v17 }
 0x198   :  { %v179_v20 = vsub.f32 %v169_v16, %v175_v18  ;;  %212 = vst.msk [vmem:[#allocation3] sm:$0xff] %vm51_vm1, %v175_v18  ;;  %189 = vperm.xlu1 %287, %v175_v18  }
 0x199   :  { %v174_v21 = vpop.xlane.xlu0 %173 }
 0x19a   :  { %v176_v22 = vmax.f32 %v170_v19, %v174_v21 }
 0x19c   :  { %v180_v23 = vsub.f32 %v170_v19, %v176_v22  ;;  %213 = vst.msk [vmem:[#allocation3 + $0x8] sm:$0xff] %vm51_vm1, %v176_v22  ;;  %194 = vperm.xlu1 %287, %v176_v22  }
 0x217   :  { %v190_v24 = vpop.permute.xlu1 %189 }
 0x218   :  { %v197_v25 = vsub.f32 %v158_v13, %v190_v24 }
 0x21a   :  { %v199_v26 = vmul.f32 1.442695, %v197_v25 }
 0x21b   :  { %v195_v27 = vpop.permute.xlu1 %194 }
 0x21c   :  { %289 = vpow2.f32 %v199_v26  ;;  %v198_v28 = vsub.f32 %v159_v11, %v195_v27 }
 0x21e   :  { %v201_v29 = vmul.f32 1.442695, %v198_v28 }
 0x220   :  { %291 = vpow2.f32 %v201_v29 }
 0x226   :  { %v290_v30 = vpop.eup %289 }
 0x227   :  { %203 = vadd.xlane.f32.xlu0 %v290_v30 }
 0x22a   :  { %v292_v31 = vpop.eup %291 }
 0x22b   :  { %205 = vadd.xlane.f32.xlu1 %v292_v31 }
 0x22c   :  { %356 = shalt.err (!%p353_p6)
}
 0x22d   :  { %s357_s19 = scalar_lea.hbm %s473_s3, 256 }
 0x22e   :  { %p358_p7 = scmp.ne.s32.totalorder %s473_s3, %s357_s19  ;;  %p361_p8 = scmp.lt.u32.totalorder %s357_s19, %s473_s3 }
 0x230   :  { %p363_p9 = pnand %p361_p8, %p358_p7 }
 0x232   :  { %366 = shalt.err (!%p363_p9)
}
 0x233   :  { %240 = dma.vmem_to_hbm [thread:$0]  %s235_s15, 256, %s473_s3, [#allocation7], %s374_s25, %s374_s25, %s375_s26   ;;  %v181_v32 = vmul.f32 1.442695, %v179_v20  ;;  %v183_v33 = vmul.f32 1.442695, %v180_v23 }
 0x234   :  { %v177_v35 = vld [vmem:[#allocation4] sm:$0xff]  ;;  %v178_v39 = vld [vmem:[#allocation4 + $0x8] sm:$0xff]  ;;  %v216_v48 = vld [vmem:[#allocation3] sm:$0xff] }
 0x235   :  { %293 = vpow2.f32 %v181_v32  ;;  %v217_v52 = vld [vmem:[#allocation3 + $0x8] sm:$0xff] }
 0x236   :  { %295 = vpow2.f32 %v183_v33 }
 0x23f   :  { %v294_v34 = vpop.eup %293 }
 0x240   :  { %v185_v36 = vmul.f32 %v294_v34, %v177_v35  ;;  %v296_v37 = vpop.eup %295 }
 0x241   :  { %v186_v41 = vmul.f32 %v296_v37, %v178_v39 }
 0x2b4   :  { %v204_v38 = vpop.xlane.xlu0 %203 }
 0x2b5   :  { %v207_v40 = vadd.f32 %v204_v38, %v185_v36 }
 0x2b7   :  { %210 = vst.msk [vmem:[#allocation4] sm:$0xff] %vm51_vm1, %v207_v40 }
 0x2b8   :  { %v206_v42 = vpop.xlane.xlu1 %205 }
 0x2b9   :  { %v208_v43 = vadd.f32 %v206_v42, %v186_v41 }
 0x2bb   :  { %211 = vst.msk [vmem:[#allocation4 + $0x8] sm:$0xff] %vm51_vm1, %v208_v43 }
 0x2be   :  { %v218_v44 = vld [vmem:[#allocation4] sm:$0xff] }
 0x2bf   :  { %297 = vlog2.f32 %v218_v44 }
 0x2c2   :  { %v219_v45 = vld [vmem:[#allocation4 + $0x8] sm:$0xff] }
 0x2c3   :  { %299 = vlog2.f32 %v219_v45 }
 0x2c9   :  { %v298_v46 = vpop.eup %297 }
 0x2ca   :  { %v221_v47 = vmul.f32 0.6931472, %v298_v46 }
 0x2cc   :  { %v224_v49 = vadd.f32 %v221_v47, %v216_v48 }
 0x2cd   :  { %v300_v50 = vpop.eup %299 }
 0x2ce   :  { %227 = vst.msk [vmem:[%s474_s4] sm:$0xff] %vm51_vm1, %v224_v49  ;;  %v223_v51 = vmul.f32 0.6931472, %v300_v50 }
 0x2d0   :  { %v225_v53 = vadd.f32 %v223_v51, %v217_v52 }
 0x2d2   :  { %228 = vst.msk [vmem:[%s474_s4 + $0x8] sm:$0xff] %vm51_vm1, %v225_v53 }
 0x2d3   :  { %371 = dma.done.wait [#allocation7], 256  }
 0x2d4   :  { %372 = vsyncadd [#allocation7], 4294967040 }
 0x2d5   :  { %248 = vsyncpa [#allocation6], 1 }
 0x2d6   :  { %249 = vsyncpa [#allocation9], 1 }
 0x2d7   :  { %250 = vsyncpa [#allocation7], 1 }

</bundles_post_ra>
